<compile_context>
chip_gen: v7x
topology: tpu7x:2x2x1
jax: 0.10.0
libtpu: 0.0.40
codegen_flags: <defaults>
</compile_context>

<pallas_src>
import functools

import jax
import jax.numpy as jnp
from jax.experimental import pallas as pl
from jax.experimental.pallas import tpu as pltpu


def _patch_embed_kernel(p_ref, w_ref, prm_ref, o_ref, *, c_real, eps):
    """Fused patch GEMM + bias + LayerNorm over the lane (embed) axis.

    p_ref   : (tm, K)   token tile of flattened patches (compute dtype)
    w_ref   : (K, Cp)   conv weight as a GEMM matrix, lane-padded to Cp
    prm_ref : (3, Cp)   rows = [bias, gamma, beta], f32, zero in padded lanes
    o_ref   : (tm, Cp)  output tile (padded lanes come out as zeros)
    """
    acc = jnp.dot(p_ref[...], w_ref[...],
                  preferred_element_type=jnp.float32)            # (tm, Cp) f32
    prm = prm_ref[...]                                           # (3, Cp) f32
    acc = acc + prm[0:1, :]                                      # + bias

    # Single-pass LayerNorm stats with explicit /c_real divisors so the
    # zero-padded lanes (index >= c_real) do not perturb mean/var.
    inv_c = 1.0 / c_real
    s1 = jnp.sum(acc, axis=-1, keepdims=True)
    s2 = jnp.sum(acc * acc, axis=-1, keepdims=True)
    mean = s1 * inv_c
    var = jnp.maximum(s2 * inv_c - mean * mean, 0.0)
    inv = jax.lax.rsqrt(var + eps)
    y = (acc - mean) * inv * prm[1:2, :] + prm[2:3, :]
    o_ref[...] = y.astype(o_ref.dtype)


def _round_up(x, m):
    return ((x + m - 1) // m) * m


def overlap_patch_embed(x, w, b, gamma, beta, *, stride, eps=1e-5, tm=1024,
                        compute_dtype=jnp.bfloat16):
    """x: (B, Cin, H, W); w: (Cout, Cin, kh, kw); b/gamma/beta: (Cout,).

    Returns (B, Ho*Wo, Cout) in x.dtype, matching
    LayerNorm(Conv2d(...)(x).flatten(2).transpose(1, 2)).
    """
    B, Cin, H, W = x.shape
    Cout, _, kh, kw = w.shape
    padding = 0 if kh % 2 == 0 else kh // 2        # matches the PyTorch module
    Ho = (H + 2 * padding - kh) // stride + 1
    Wo = (W + 2 * padding - kw) // stride + 1
    N = Ho * Wo
    M = B * N
    K = kh * kw * Cin

    # ---- patch extraction (single XLA op, no 49-slice concat) ----
    # K-axis feature ordering is channel-major: (ci, dy, dx).
    # TODO(synk): fusing extraction into the kernel (pl.ANY input + manual row
    # slab DMAs) would remove this patches HBM round-trip entirely.
    x_nhwc = jnp.transpose(x, (0, 2, 3, 1)).astype(compute_dtype)
    patches = jax.lax.conv_general_dilated_patches(
        x_nhwc, (kh, kw), (stride, stride),
        padding=((padding, padding), (padding, padding)),
        dimension_numbers=("NHWC", "HWIO", "NHWC"))              # (B, Ho, Wo, K)
    patches = patches.reshape(M, K)

    # Conv weight -> GEMM matrix matching the (ci, dy, dx) patch ordering.
    w_mat = jnp.transpose(w, (1, 2, 3, 0)).reshape(K, Cout).astype(compute_dtype)

    # ---- lane-pad embed dim to a multiple of 128 (unmasked stores) ----
    Cp = max(128, _round_up(Cout, 128))
    if Cp != Cout:
        w_mat = jnp.pad(w_mat, ((0, 0), (0, Cp - Cout)))
    params = jnp.zeros((3, Cp), jnp.float32)
    params = params.at[0, :Cout].set(b.astype(jnp.float32))
    params = params.at[1, :Cout].set(gamma.astype(jnp.float32))
    params = params.at[2, :Cout].set(beta.astype(jnp.float32))

    # ---- pad K to a 256 multiple only for MXU-bound stages ----
    K_eff = K
    if Cout >= 256 and K % 256 != 0:
        K_eff = _round_up(K, 256)
        patches = jnp.pad(patches, ((0, 0), (0, K_eff - K)))
        w_mat = jnp.pad(w_mat, ((0, K_eff - K), (0, 0)))

    # ---- token tiling (1-D parallel grid; megacore shards this axis) ----
    in_item = jnp.dtype(compute_dtype).itemsize
    out_item = jnp.dtype(x.dtype).itemsize

    def vmem_est(t):
        return (2 * t * K_eff * in_item          # double-buffered patch tile
                + 2 * t * Cp * out_item          # double-buffered output tile
                + 2 * K_eff * Cp * in_item       # resident weight (+pipe buffer)
                + 2 * 3 * Cp * 4)                # packed bias/gamma/beta
    # TODO(synk): on v7x, pipeline_mode=pl.Buffered(1) on the constant-index
    # operands would reclaim their second pipeline buffer.

    tm = max(16, min(int(tm), _round_up(M, 16)))
    tm = max(16, (tm // 16) * 16)
    while tm > 64 and vmem_est(tm) > 40 * 1024 * 1024:
        tm = max(64, tm // 2)
    m_pad = _round_up(M, tm)
    if m_pad != M:
        patches = jnp.pad(patches, ((0, m_pad - M), (0, 0)))

    # Fits v7x's 64 MiB physical VMEM as well as v5e/v6e.
    vmem_limit = int(min(48 * 1024 * 1024,
                         max(16 * 1024 * 1024, 2 * vmem_est(tm))))

    kernel = functools.partial(_patch_embed_kernel, c_real=Cout, eps=eps)
    out = pl.pallas_call(
        kernel,
        out_shape=jax.ShapeDtypeStruct((m_pad, Cp), x.dtype),
        grid_spec=pltpu.PrefetchScalarGridSpec(
            num_scalar_prefetch=0,
            grid=(m_pad // tm,),
            in_specs=[
                pl.BlockSpec((tm, K_eff), lambda i: (i, 0)),     # patch tile
                pl.BlockSpec((K_eff, Cp), lambda i: (0, 0)),     # resident weight
                pl.BlockSpec((3, Cp), lambda i: (0, 0)),         # bias/gamma/beta
            ],
            out_specs=pl.BlockSpec((tm, Cp), lambda i: (i, 0)),
        ),
        compiler_params=pltpu.CompilerParams(
            dimension_semantics=("parallel",),
            vmem_limit_bytes=vmem_limit,
        ),
    )(patches, w_mat, params)

    return out[:M, :Cout].reshape(B, N, Cout)


def overlap_patch_embed_ref(x, w, b, gamma, beta, *, stride, eps=1e-5):
    """Pure-JAX reference mirroring the PyTorch forward."""
    kh = w.shape[2]
    padding = 0 if kh % 2 == 0 else kh // 2
    y = jax.lax.conv_general_dilated(
        x, w, window_strides=(stride, stride),
        padding=((padding, padding), (padding, padding)),
        dimension_numbers=("NCHW", "OIHW", "NCHW"),
        precision=jax.lax.Precision.HIGHEST)
    y = y + b[None, :, None, None]
    B, C, Ho, Wo = y.shape
    y = y.reshape(B, C, Ho * Wo).transpose(0, 2, 1)              # (B, N, C)
    mean = jnp.mean(y, axis=-1, keepdims=True)
    var = jnp.mean((y - mean) ** 2, axis=-1, keepdims=True)
    return (y - mean) * jax.lax.rsqrt(var + eps) * gamma + beta


def _make_inputs(key, B, Cin, H, W, patch, embed):
    k_x, k_w, k_b, k_g, k_be = jax.random.split(key, 5)
    x = jax.random.normal(k_x, (B, Cin, H, W), dtype=jnp.float32)
    fan_in = Cin * patch * patch
    bound = 1.0 / (fan_in ** 0.5)
    w = jax.random.uniform(k_w, (embed, Cin, patch, patch),
                           minval=-bound, maxval=bound, dtype=jnp.float32)
    b = jax.random.uniform(k_b, (embed,), minval=-bound, maxval=bound,
                           dtype=jnp.float32)
    gamma = 1.0 + 0.1 * jax.random.normal(k_g, (embed,), dtype=jnp.float32)
    beta = 0.1 * jax.random.normal(k_be, (embed,), dtype=jnp.float32)
    return x, w, b, gamma, beta


if __name__ == "__main__":
    key = jax.random.PRNGKey(0)
    k1, k2 = jax.random.split(key)

    # Case 1: stage-1-like patch embed (embed_dim < 128 exercises the
    # lane-padded, unmasked-store output path).
    B, Cin, H, W = 2, 3, 16, 16
    patch_size, stride, embed_dim = 7, 4, 32
    x, w, b, gamma, beta = _make_inputs(k1, B, Cin, H, W, patch_size, embed_dim)

    ref = overlap_patch_embed_ref(x, w, b, gamma, beta, stride=stride)
    Ho = (H + 2 * (patch_size // 2) - patch_size) // stride + 1

    out = jax.block_until_ready(
        overlap_patch_embed(x, w, b, gamma, beta, stride=stride))   # bf16 compute
    assert out.shape == (B, Ho * Ho, embed_dim)
    err = float(jnp.max(jnp.abs(out - ref)))
    assert jnp.allclose(out, ref, atol=5e-2, rtol=5e-2), err

    out_f32 = jax.block_until_ready(
        overlap_patch_embed(x, w, b, gamma, beta, stride=stride,
                            compute_dtype=jnp.float32))
    err_f32 = float(jnp.max(jnp.abs(out_f32 - ref)))
    assert jnp.allclose(out_f32, ref, atol=1e-4, rtol=1e-4), err_f32

    # Case 2: later-stage-like patch embed (embed_dim >= 256 exercises the
    # K -> multiple-of-256 MXU padding path).
    B2, Cin2, H2, W2 = 1, 8, 8, 8
    patch2, stride2, embed2 = 3, 2, 256
    x2, w2, b2, g2, be2 = _make_inputs(k2, B2, Cin2, H2, W2, patch2, embed2)
    ref2 = overlap_patch_embed_ref(x2, w2, b2, g2, be2, stride=stride2)
    out2 = jax.block_until_ready(
        overlap_patch_embed(x2, w2, b2, g2, be2, stride=stride2))
    assert out2.shape == ref2.shape
    err2 = float(jnp.max(jnp.abs(out2 - ref2)))
    assert jnp.allclose(out2, ref2, atol=5e-2, rtol=5e-2), err2

    print("KERNEL_OK")
</pallas_src>

<mosaic_0001>
module attributes {stable_mosaic.version = 11 : i64} {
  func.func @_patch_embed_kernel(%arg0: i32, %arg1: memref<32x147xbf16, #tpu.memory_space<vmem>>, %arg2: memref<147x128xbf16, #tpu.memory_space<vmem>>, %arg3: memref<3x128xf32, #tpu.memory_space<vmem>>, %arg4: memref<32x128xf32, #tpu.memory_space<vmem>>) attributes {dimension_semantics = [#tpu.dimension_semantics<parallel>], iteration_bounds = array<i64: 1>, scalar_prefetch = 0 : i64, scratch_operands = 0 : i64, tpu.core_type = #tpu.core_type<tc>, window_params = [{transform_indices = @transform_0, window_bounds = array<i64: 32, 147>}, {pipeline_mode = #tpu.pipeline_mode<synchronous>, transform_indices = @transform_1, window_bounds = array<i64: 147, 128>}, {pipeline_mode = #tpu.pipeline_mode<synchronous>, transform_indices = @transform_2, window_bounds = array<i64: 3, 128>}, {transform_indices = @transform_3, window_bounds = array<i64: 32, 128>}]} {
    %c0 = arith.constant 0 : index
    %c0_0 = arith.constant 0 : index
    %0 = vector.load %arg1[%c0, %c0_0] : memref<32x147xbf16, #tpu.memory_space<vmem>>, vector<32x147xbf16>
    %c0_1 = arith.constant 0 : index
    %c0_2 = arith.constant 0 : index
    %1 = vector.load %arg2[%c0_1, %c0_2] : memref<147x128xbf16, #tpu.memory_space<vmem>>, vector<147x128xbf16>
    %cst = arith.constant dense<0.000000e+00> : vector<32x128xf32>
    %2 = tpu.matmul %0, %1, %cst {dimension_numbers = #tpu.dot_dimension_numbers<[1], [0], [0], [1], [0, 0, 1, 1], [], []>} : vector<32x147xbf16>, vector<147x128xbf16>, vector<32x128xf32> -> vector<32x128xf32>
    %c0_3 = arith.constant 0 : index
    %c0_4 = arith.constant 0 : index
    %3 = vector.load %arg3[%c0_3, %c0_4] : memref<3x128xf32, #tpu.memory_space<vmem>>, vector<3x128xf32>
    %4 = vector.extract_strided_slice %3 {offsets = [0, 0], sizes = [1, 128], strides = [1, 1]} : vector<3x128xf32> to vector<1x128xf32>
    %5 = vector.broadcast %4 : vector<1x128xf32> to vector<32x128xf32>
    %6 = arith.addf %2, %5 : vector<32x128xf32>
    %cst_5 = arith.constant dense<0.000000e+00> : vector<32xf32>
    %7 = vector.multi_reduction <add>, %6, %cst_5 [1] : vector<32x128xf32> to vector<32xf32>
    %8 = vector.shape_cast %7 : vector<32xf32> to vector<32x1xf32>
    %9 = arith.mulf %6, %6 : vector<32x128xf32>
    %cst_6 = arith.constant dense<0.000000e+00> : vector<32xf32>
    %10 = vector.multi_reduction <add>, %9, %cst_6 [1] : vector<32x128xf32> to vector<32xf32>
    %11 = vector.shape_cast %10 : vector<32xf32> to vector<32x1xf32>
    %cst_7 = arith.constant 3.125000e-02 : f32
    %12 = vector.broadcast %cst_7 : f32 to vector<32x1xf32>
    %13 = arith.mulf %8, %12 : vector<32x1xf32>
    %cst_8 = arith.constant 3.125000e-02 : f32
    %14 = vector.broadcast %cst_8 : f32 to vector<32x1xf32>
    %15 = arith.mulf %11, %14 : vector<32x1xf32>
    %16 = arith.mulf %13, %13 : vector<32x1xf32>
    %17 = arith.subf %15, %16 : vector<32x1xf32>
    %cst_9 = arith.constant 0.000000e+00 : f32
    %18 = vector.broadcast %cst_9 : f32 to vector<32x1xf32>
    %19 = arith.maximumf %17, %18 : vector<32x1xf32>
    %cst_10 = arith.constant 9.99999974E-6 : f32
    %20 = vector.broadcast %cst_10 : f32 to vector<32x1xf32>
    %21 = arith.addf %19, %20 : vector<32x1xf32>
    %22 = math.rsqrt %21 : vector<32x1xf32>
    %23 = vector.broadcast %13 : vector<32x1xf32> to vector<32x128xf32>
    %24 = arith.subf %6, %23 : vector<32x128xf32>
    %25 = vector.broadcast %22 : vector<32x1xf32> to vector<32x128xf32>
    %26 = arith.mulf %24, %25 : vector<32x128xf32>
    %27 = vector.extract_strided_slice %3 {offsets = [1, 0], sizes = [1, 128], strides = [1, 1]} : vector<3x128xf32> to vector<1x128xf32>
    %28 = vector.broadcast %27 : vector<1x128xf32> to vector<32x128xf32>
    %29 = arith.mulf %26, %28 : vector<32x128xf32>
    %30 = vector.extract_strided_slice %3 {offsets = [2, 0], sizes = [1, 128], strides = [1, 1]} : vector<3x128xf32> to vector<1x128xf32>
    %31 = vector.broadcast %30 : vector<1x128xf32> to vector<32x128xf32>
    %32 = arith.addf %29, %31 : vector<32x128xf32>
    %c0_11 = arith.constant 0 : index
    %c0_12 = arith.constant 0 : index
    %33 = vector.load %arg4[%c0_11, %c0_12] : memref<32x128xf32, #tpu.memory_space<vmem>>, vector<32x128xf32>
    tpu.vector_store %arg4[%c0_11, %c0_12], %32 {strides = array<i32>} : memref<32x128xf32, #tpu.memory_space<vmem>>, vector<32x128xf32>,
    return
  }
  func.func @transform_0(%arg0: i32) -> (i32, i32) {
    %c0_i32 = arith.constant 0 : i32
    %c0_i32_0 = arith.constant 0 : i32
    return %arg0, %c0_i32 : i32, i32
  }
  func.func @transform_1(%arg0: i32) -> (i32, i32) {
    %c0_i32 = arith.constant 0 : i32
    %c0_i32_0 = arith.constant 0 : i32
    %c0_i32_1 = arith.constant 0 : i32
    return %c0_i32, %c0_i32_0 : i32, i32
  }
  func.func @transform_2(%arg0: i32) -> (i32, i32) {
    %c0_i32 = arith.constant 0 : i32
    %c0_i32_0 = arith.constant 0 : i32
    %c0_i32_1 = arith.constant 0 : i32
    return %c0_i32, %c0_i32_0 : i32, i32
  }
  func.func @transform_3(%arg0: i32) -> (i32, i32) {
    %c0_i32 = arith.constant 0 : i32
    %c0_i32_0 = arith.constant 0 : i32
    return %arg0, %c0_i32 : i32, i32
  }
}

</mosaic_0001>

<bundles_post_ra>
// kernel: tpu_custom_call.1
= control target key start
LH: loop header
LB: loop body
LE: loop exit
PB: predicated region body
PF: predicated region fallthrough
CT: control target
= control target key end

     0   :  { %8 = vsyncpa [#allocation3], 0  ;;  %s547_s0 = inlined_call_operand.hbm [shape: bf16[32,147], index: 0, kind: input, shape index: {}]   ;;  %s548_s1 = inlined_call_operand.hbm [shape: bf16[147,128], index: 1, kind: input, shape index: {}]   ;;  %s549_s2 = inlined_call_operand.vmem [shape: f32[3,128], index: 2, kind: input, shape index: {}]   ;;  %s550_s3 = inlined_call_operand.hbm [shape: f32[32,128], index: 3, kind: output, shape index: {}]  }
   0x1   :  { %9 = vsyncpa [#allocation6], 0 }
   0x2   :  { %10 = vsyncpa [#allocation4], 0  ;;  %s445_s12 = smov [#allocation2]   ;;  %s373_s16 = scalar_lea.hbm %s547_s0, 512 }
   0x3   :  { %s16_s13 = sshll.u32 %s445_s12, 4  ;;  %p374_p0 = scmp.ne.s32.totalorder %s547_s0, %s373_s16  ;;  %s17_s13 = int_to_ptr.vmem [resolvable:$true] %s16_s13 }
   0x4   :  { %p377_p1 = scmp.lt.u32.totalorder %s373_s16, %s547_s0 }
   0x6   :  { %p379_p2 = pnand %p377_p1, %p374_p0 }
   0x8   :  { %382 = shalt.err (!%p379_p2)
}
   0x9   :  { %s383_s21 = scalar_lea.vmem %s17_s13, 512  ;;  %p388_p4 = scmp.lt.s32.totalorder %s17_s13, %s17_s13 }
   0xa   :  { %p384_p3 = scmp.ne.s32.totalorder %s17_s13, %s383_s21  ;;  %p389_p5 = scmp.lt.s32.totalorder %s383_s21, %s383_s21 }
   0xc   :  { %p390_p6 = por %p389_p5, %p388_p4 }
   0xe   :  { %p391_p7 = pnand %p390_p6, %p384_p3 }
  0x10   :  { %394 = shalt.err (!%p391_p7)
}
  0x11   :  { %s446_s22 = smov 128   ;;  %s447_s23 = smov 8  }
  0x12   :  { %22 = dma.hbm_to_vmem [thread:$0]  %s547_s0, 512, %s17_s13, [#allocation3], %s446_s22, %s446_s22, %s447_s23  }
  0x13   :  { %s448_s26 = smov [#allocation5]   ;;  %s395_s30 = scalar_lea.hbm %s548_s1, 1216 }
  0x14   :  { %s28_s27 = sshll.u32 %s448_s26, 4  ;;  %p396_p8 = scmp.ne.s32.totalorder %s548_s1, %s395_s30  ;;  %s29_s27 = int_to_ptr.vmem [resolvable:$true] %s28_s27 }
  0x15   :  { %p399_p9 = scmp.lt.u32.totalorder %s395_s30, %s548_s1 }
  0x17   :  { %p401_p10 = pnand %p399_p9, %p396_p8 }
  0x19   :  { %404 = shalt.err (!%p401_p10)
}
  0x1a   :  { %s405_s8 = scalar_lea.vmem %s29_s27, 1216  ;;  %p410_p12 = scmp.lt.s32.totalorder %s29_s27, %s29_s27 }
  0x1b   :  { %p406_p11 = scmp.ne.s32.totalorder %s29_s27, %s405_s8  ;;  %p411_p13 = scmp.lt.s32.totalorder %s405_s8, %s405_s8 }
  0x1d   :  { %p412_p0 = por %p411_p13, %p410_p12 }
  0x1f   :  { %p413_p1 = pnand %p412_p0, %p406_p11 }
  0x21   :  { %416 = shalt.err (!%p413_p1)
}
  0x22   :  { %s449_s0 = smov 64   ;;  %s450_s9 = smov 4  }
  0x23   :  { %34 = dma.hbm_to_vmem [thread:$0]  %s548_s1, 1216, %s29_s27, [#allocation6], %s449_s0, %s449_s0, %s450_s9  }
  0x24   :  { %439 = dma.done.wait [#allocation3], 512  }
  0x25   :  { %440 = vsyncadd [#allocation3], 4294966784 }
  0x26   :  { %441 = dma.done.wait [#allocation6], 1216  }
  0x27   :  { %442 = vsyncadd [#allocation6], 4294966080  ;;  %v451_v0 = vmov 0   ;;  %v349_v1 = vld [vmem:[#allocation5] sm:$0xff]   ;;  %v350_v2 = vld [vmem:[#allocation5 + $0x8] sm:$0xff]   ;;  %vm147_vm0 = vcmask 154624   ;;  %v68_v19 = vlaneseq }
  0x28   :  { %161 = vmatprep.subr.bf16.mxu0 %v451_v0  ;;  %320 = vmatprep.subr.bf16.mxu1 %v451_v0  ;;  %v351_v3 = vld [vmem:[#allocation5 + $0x10] sm:$0xff]   ;;  %v352_v4 = vld [vmem:[#allocation5 + $0x18] sm:$0xff]   ;;  %v361_v5 = vld [vmem:[#allocation2 + $0x4] ss:$8 sps:$4 sm:$0xff]   ;;  %vm154_vm1 = vcmask 1040384   ;;  %vm155_vm2 = vcmask 1041408  }
  0x29   :  { %162 = vmatpush1.bf16.msra.mxu0 %v349_v1  ;;  %330 = vmatpush1.bf16.msra.mxu1 %v349_v1  ;;  %v364_v6 = vld [vmem:[#allocation2 + $0x14] ss:$8 sps:$4 sm:$0xff]   ;;  %v353_v7 = vld [vmem:[#allocation5 + $0x20] sm:$0xff]   ;;  %v354_v8 = vld [vmem:[#allocation5 + $0x28] sm:$0xff]   ;;  %v452_v11 = vmov 65535   ;;  %v501_v20 = vshrl.u32 %v68_v19, 7 }
  0x2a   :  { %163 = vmatprep.subr.bf16.mxu0 %v451_v0  ;;  %321 = vmatprep.subr.bf16.mxu1 %v451_v0  ;;  %v355_v9 = vld [vmem:[#allocation5 + $0x30] sm:$0xff]   ;;  %v356_v10 = vld [vmem:[#allocation5 + $0x38] sm:$0xff]   ;;  %v156_v12 = vsel %vm154_vm1, 4294967295, %v452_v11  ;;  %v357_v13 = vld [vmem:[#allocation5 + $0x40] sm:$0xff]  }
  0x2b   :  { %318 = vmatprep.mubr.msk.bf16.mxu0 %vm147_vm0, %v361_v5  ;;  %319 = vmatprep.mubr.msk.bf16.mxu1 %vm147_vm0, %v364_v6  ;;  %v358_v14 = vld [vmem:[#allocation5 + $0x48] ss:$0 sps:$4 sm:$0x33]   ;;  %v157_v15 = vsel %vm155_vm2, %v156_v12, 0  ;;  %v362_v18 = vld [vmem:[#allocation2 + $0x10] ss:$8 sps:$4 sm:$0xff]  }
  0x2c   :  { %v159_v16 = vand.u32 %v358_v14, %v157_v15  ;;  %v359_v17 = vld [vmem:[#allocation2] ss:$8 sps:$4 sm:$0xff]   ;;  %v70_v21 = vsub.s32 0, %v501_v20 }
  0x2d   :  { %164 = vmatpush1.bf16.msra.mxu0 %v350_v2  ;;  %331 = vmatpush1.bf16.msra.mxu1 %v350_v2  ;;  %v507_v22 = vld [vmem:[%s549_s2] sm:$0x7]  ;;  %s453_s2 = smov [#allocation7]  }
  0x2e   :  { %165 = vmatprep.subr.bf16.mxu0 %v451_v0  ;;  %322 = vmatprep.subr.bf16.mxu1 %v451_v0  ;;  %v71_v23 = vrot.slane %v507_v22, %v70_v21  ;;  %s291_s13 = sshll.u32 %s453_s2, 4  ;;  %s292_s13 = int_to_ptr.vmem [resolvable:$true] %s291_s13 }
  0x2f   :  { %s417_s14 = scalar_lea.vmem %s292_s13, 512  ;;  %p422_p3 = scmp.lt.s32.totalorder %s292_s13, %s292_s13 }
  0x30   :  { %p418_p2 = scmp.ne.s32.totalorder %s292_s13, %s417_s14  ;;  %p423_p4 = scmp.lt.s32.totalorder %s417_s14, %s417_s14 }
  0x31   :  { %166 = vmatpush1.bf16.msra.mxu0 %v351_v3  ;;  %332 = vmatpush1.bf16.msra.mxu1 %v351_v3 }
  0x32   :  { %167 = vmatprep.subr.bf16.mxu0 %v451_v0  ;;  %323 = vmatprep.subr.bf16.mxu1 %v451_v0  ;;  %p424_p5 = por %p423_p4, %p422_p3 }
  0x34   :  { %p425_p6 = pnand %p424_p5, %p418_p2 }
  0x35   :  { %168 = vmatpush1.bf16.msra.mxu0 %v352_v4  ;;  %333 = vmatpush1.bf16.msra.mxu1 %v352_v4 }
  0x36   :  { %169 = vmatprep.subr.bf16.mxu0 %v451_v0  ;;  %324 = vmatprep.subr.bf16.mxu1 %v451_v0 }
  0x39   :  { %170 = vmatpush1.bf16.msra.mxu0 %v353_v7  ;;  %334 = vmatpush1.bf16.msra.mxu1 %v353_v7 }
  0x3a   :  { %171 = vmatprep.subr.bf16.mxu0 %v451_v0  ;;  %325 = vmatprep.subr.bf16.mxu1 %v451_v0 }
  0x3d   :  { %172 = vmatpush1.bf16.msra.mxu0 %v354_v8  ;;  %335 = vmatpush1.bf16.msra.mxu1 %v354_v8  ;;  %v268_v8 = vsub.s32 1, %v501_v20 }
  0x3e   :  { %173 = vmatprep.subr.bf16.mxu0 %v451_v0  ;;  %326 = vmatprep.subr.bf16.mxu1 %v451_v0 }
  0x41   :  { %174 = vmatpush1.bf16.msra.mxu0 %v355_v9  ;;  %336 = vmatpush1.bf16.msra.mxu1 %v355_v9  ;;  %v276_v9 = vsub.s32 2, %v501_v20 }
  0x42   :  { %175 = vmatprep.subr.bf16.mxu0 %v451_v0  ;;  %327 = vmatprep.subr.bf16.mxu1 %v451_v0 }
  0x43   :  { %v277_v15 = vrot.slane %v507_v22, %v276_v9 }
  0x45   :  { %176 = vmatpush1.bf16.msra.mxu0 %v356_v10  ;;  %337 = vmatpush1.bf16.msra.mxu1 %v356_v10  ;;  %v269_v10 = vrot.slane %v507_v22, %v268_v8 }
  0x46   :  { %177 = vmatprep.subr.bf16.mxu0 %v451_v0  ;;  %328 = vmatprep.subr.bf16.mxu1 %v451_v0 }
  0x49   :  { %178 = vmatpush1.bf16.msra.mxu0 %v357_v13  ;;  %338 = vmatpush1.bf16.msra.mxu1 %v357_v13 }
  0x4a   :  { %179 = vmatprep.subr.bf16.mxu0 %v451_v0  ;;  %329 = vmatprep.subr.bf16.mxu1 %v451_v0 }
  0x4d   :  { %180 = vmatpush1.bf16.msra.mxu0 %v159_v16  ;;  %339 = vmatpush1.bf16.msra.mxu1 %v159_v16 }
  0x50   :  { %194 = vmatmul.mubr.bf16.vlgmr.msra.gmra.mrb[0].mxu0 %v359_v17  ;;  %202 = vmatmul.mubr.bf16.vlgmr.msra.gmra.mrb[0].mxu1 %v362_v18 }
 0x123   :  { %v195_v24 = vpop.f32.mrb[0].mxu0  ;;  %v203_v25 = vpop.f32.mrb[0].mxu1 }
 0x124   :  { %v510_v26 = vadd.f32 %v195_v24, %v71_v23  ;;  %v512_v27 = vadd.f32 %v203_v25, %v71_v23  ;;  %v197_v28 = vpop.f32.mrb[1].mxu0  ;;  %v205_v29 = vpop.f32.mrb[1].mxu1 }
 0x125   :  { %v198_v30 = vpop.f32.mrb[2].mxu0  ;;  %v206_v31 = vpop.f32.mrb[2].mxu1 }
 0x126   :  { %v208_v32 = vpop.f32.mrb[3].mxu1  ;;  %214 = vadd.xlane.f32.xlu1 %v512_v27  ;;  %v200_v33 = vpop.f32.mrb[3].mxu0  ;;  %210 = vadd.xlane.f32.xlu0 %v510_v26  ;;  %v199_v34 = vadd.f32 %v198_v30, %v71_v23  ;;  %v516_v35 = vadd.f32 %v206_v31, %v71_v23  ;;  %v218_v37 = vmul.f32 %v510_v26, %v510_v26 }
 0x127   :  { %v220_v39 = vmul.f32 %v512_v27, %v512_v27 }
 0x128   :  { %v219_v36 = vmul.f32 %v199_v34, %v199_v34  ;;  %v221_v38 = vmul.f32 %v516_v35, %v516_v35 }
 0x12a   :  { %216 = vadd.xlane.f32.xlu1 %v516_v35  ;;  %212 = vadd.xlane.f32.xlu0 %v199_v34 }
 0x12e   :  { %224 = vadd.xlane.f32.xlu1 %v219_v36  ;;  %222 = vadd.xlane.f32.xlu0 %v218_v37 }
 0x132   :  { %228 = vadd.xlane.f32.xlu1 %v221_v38  ;;  %226 = vadd.xlane.f32.xlu0 %v220_v39 }
 0x1b3   :  { %v215_v40 = vpop.xlane.xlu1 %214  ;;  %v211_v41 = vpop.xlane.xlu0 %210 }
 0x1b4   :  { %v230_v44 = vmul.f32 0.03125, %v211_v41  ;;  %v232_v46 = vmul.f32 0.03125, %v215_v40 }
 0x1b6   :  { %v238_v50 = vmul.f32 %v230_v44, %v230_v44  ;;  %v240_v56 = vmul.f32 %v232_v46, %v232_v46  ;;  %v258_v13 = vsub.f32 %v510_v26, %v230_v44  ;;  %v260_v23 = vsub.f32 %v512_v27, %v232_v46 }
 0x1b7   :  { %v217_v42 = vpop.xlane.xlu1 %216  ;;  %v213_v43 = vpop.xlane.xlu0 %212 }
 0x1b8   :  { %v231_v45 = vmul.f32 0.03125, %v213_v43  ;;  %v233_v47 = vmul.f32 0.03125, %v217_v42 }
 0x1ba   :  { %v239_v51 = vmul.f32 %v231_v45, %v231_v45  ;;  %v241_v57 = vmul.f32 %v233_v47, %v233_v47  ;;  %v259_v11 = vsub.f32 %v199_v34, %v231_v45  ;;  %v261_v18 = vsub.f32 %v516_v35, %v233_v47 }
 0x1bb   :  { %v225_v48 = vpop.xlane.xlu1 %224  ;;  %v223_v49 = vpop.xlane.xlu0 %222 }
 0x1bc   :  { %v235_v52 = vmul.f32 0.03125, %v225_v48  ;;  %v234_v53 = vmul.f32 0.03125, %v223_v49 }
 0x1be   :  { %v243_v54 = vsub.f32 %v235_v52, %v239_v51  ;;  %v242_v55 = vsub.f32 %v234_v53, %v238_v50 }
 0x1bf   :  { %v229_v58 = vpop.xlane.xlu1 %228  ;;  %v227_v59 = vpop.xlane.xlu0 %226 }
 0x1c0   :  { %v247_v60 = vmax.f32 %v243_v54, 0.0  ;;  %v246_v61 = vmax.f32 %v242_v55, 0.0  ;;  %v237_v62 = vmul.f32 0.03125, %v229_v58  ;;  %v236_v63 = vmul.f32 0.03125, %v227_v59 }
 0x1c2   :  { %v251_v0 = vadd.f32 1e-05, %v247_v60  ;;  %v250_v1 = vadd.f32 1e-05, %v246_v61  ;;  %v245_v2 = vsub.f32 %v237_v62, %v241_v57  ;;  %v244_v3 = vsub.f32 %v236_v63, %v240_v56 }
 0x1c4   :  { %365 = vrsqrt.f32 %v251_v0  ;;  %v249_v4 = vmax.f32 %v245_v2, 0.0  ;;  %v248_v5 = vmax.f32 %v244_v3, 0.0 }
 0x1c5   :  { %367 = vrsqrt.f32 %v250_v1 }
 0x1c6   :  { %v253_v6 = vadd.f32 1e-05, %v249_v4  ;;  %v252_v7 = vadd.f32 1e-05, %v248_v5 }
 0x1c8   :  { %369 = vrsqrt.f32 %v253_v6 }
 0x1c9   :  { %371 = vrsqrt.f32 %v252_v7 }
 0x1ce   :  { %v366_v12 = vpop.eup %365 }
 0x1cf   :  { %v368_v14 = vpop.eup %367  ;;  %v263_v16 = vmul.f32 %v366_v12, %v259_v11 }
 0x1d0   :  { %v262_v17 = vmul.f32 %v368_v14, %v258_v13 }
 0x1d1   :  { %v271_v19 = vmul.f32 %v269_v10, %v263_v16 }
 0x1d2   :  { %v370_v21 = vpop.eup %369  ;;  %v270_v24 = vmul.f32 %v269_v10, %v262_v17 }
 0x1d3   :  { %v372_v25 = vpop.eup %371  ;;  %v265_v20 = vmul.f32 %v370_v21, %v261_v18  ;;  %v279_v28 = vadd.f32 %v277_v15, %v271_v19 }
 0x1d4   :  { %v264_v29 = vmul.f32 %v372_v25, %v260_v23  ;;  %v278_v30 = vadd.f32 %v277_v15, %v270_v24 }
 0x1d5   :  { %v273_v31 = vmul.f32 %v269_v10, %v265_v20  ;;  %283 = vst [vmem:[#allocation7 + $0x8] sm:$0xff] %v279_v28 }
 0x1d6   :  { %v272_v26 = vmul.f32 %v269_v10, %v264_v29  ;;  %282 = vst [vmem:[#allocation7] sm:$0xff] %v278_v30 }
 0x1d7   :  { %v281_v22 = vadd.f32 %v277_v15, %v273_v31 }
 0x1d8   :  { %v280_v32 = vadd.f32 %v277_v15, %v272_v26 }
 0x1d9   :  { %285 = vst [vmem:[#allocation7 + $0x18] sm:$0xff] %v281_v22 }
 0x1da   :  { %284 = vst [vmem:[#allocation7 + $0x10] sm:$0xff] %v280_v32 }
 0x1db   :  { %428 = shalt.err (!%p425_p6)
}
 0x1dc   :  { %s429_s17 = scalar_lea.hbm %s550_s3, 512 }
 0x1dd   :  { %p430_p7 = scmp.ne.s32.totalorder %s550_s3, %s429_s17  ;;  %p433_p8 = scmp.lt.u32.totalorder %s429_s17, %s550_s3 }
 0x1df   :  { %p435_p9 = pnand %p433_p8, %p430_p7 }
 0x1e1   :  { %438 = shalt.err (!%p435_p9)
}
 0x1e2   :  { %297 = dma.vmem_to_hbm [thread:$0]  %s292_s13, 512, %s550_s3, [#allocation4], %s446_s22, %s446_s22, %s447_s23  }
 0x1e3   :  { %443 = dma.done.wait [#allocation4], 512  }
 0x1e4   :  { %444 = vsyncadd [#allocation4], 4294966784 }
 0x1e5   :  { %301 = vsyncpa [#allocation3], 1 }
 0x1e6   :  { %302 = vsyncpa [#allocation6], 1 }
 0x1e7   :  { %303 = vsyncpa [#allocation4], 1 }

</bundles_post_ra>
